<compile_context>
chip_gen: v6e
topology: v6e:2x2x1
jax: 0.10.0
libtpu: 0.0.40
codegen_flags: <defaults>
</compile_context>

<pallas_src>
import functools
import math

import numpy as np
import jax
import jax.numpy as jnp
from jax.experimental import pallas as pl
from jax.experimental.pallas import tpu as pltpu

BN_EPS = 1e-5
EXPANSION = 4           # SK bottleneck expansion
CHUNK = 128             # output-channel chunk for grouped convs (lane width)


def _round_up(x, m):
    return (x + m - 1) // m * m


def _tm(m):
    return min(512, _round_up(max(m, 1), 16))


def _tn(n):
    return min(256, _round_up(n, 128))


def _tk(k):
    return min(512, _round_up(k, 128))


# ---------------------------------------------------------------------------
# Fused matmul Pallas kernel: (X @ W) * scale + bias (+ residual) (+ ReLU)
# bf16 operands, f32 accumulator, f32 epilogue.
# ---------------------------------------------------------------------------
@functools.lru_cache(maxsize=None)
def _mm_kernel(relu: bool, has_res: bool):
    def kernel(x_ref, w_ref, s_ref, b_ref, *rest):
        if has_res:
            r_ref, o_ref, acc_ref = rest
        else:
            o_ref, acc_ref = rest
        k = pl.program_id(2)

        @pl.when(k == 0)
        def _():
            acc_ref[...] = jnp.zeros_like(acc_ref)

        acc_ref[...] += jnp.dot(x_ref[...], w_ref[...],
                                preferred_element_type=jnp.float32)

        @pl.when(k == pl.num_programs(2) - 1)
        def _():
            out = acc_ref[...] * s_ref[...] + b_ref[...]
            if has_res:
                out = out + r_ref[...].astype(jnp.float32)
            if relu:
                out = jnp.maximum(out, 0.0)
            o_ref[...] = out.astype(o_ref.dtype)

    return kernel


def fused_matmul(x, p, residual=None, relu=False, out_dtype=jnp.bfloat16):
    """out = [relu]((x @ W) * scale + bias [+ residual]).

    p holds the weight/scale/bias already padded to tile-aligned shapes and the
    weight already cast to bf16 (done once at build time)."""
    M = x.shape[0]
    K, N = p["K"], p["N"]
    wp, sp, bp = p["w"], p["s"], p["b"]
    Kp, Np = wp.shape
    tm, tn, tk = _tm(M), _tn(N), _tk(K)
    Mp = _round_up(M, tm)

    xb = x.astype(jnp.bfloat16)
    if (Mp, Kp) != (M, K):
        xb = jnp.pad(xb, ((0, Mp - M), (0, Kp - K)))

    has_res = residual is not None
    ins = [xb, wp, sp, bp]
    in_specs = [
        pl.BlockSpec((tm, tk), lambda i, j, k: (i, k)),
        pl.BlockSpec((tk, tn), lambda i, j, k: (k, j)),
        pl.BlockSpec((1, tn), lambda i, j, k: (0, j)),
        pl.BlockSpec((1, tn), lambda i, j, k: (0, j)),
    ]
    if has_res:
        rb = residual.astype(jnp.bfloat16)
        if rb.shape != (Mp, Np):
            rb = jnp.pad(rb, ((0, Mp - M), (0, Np - N)))
        ins.append(rb)
        in_specs.append(pl.BlockSpec((tm, tn), lambda i, j, k: (i, j)))

    out = pl.pallas_call(
        _mm_kernel(relu, has_res),
        out_shape=jax.ShapeDtypeStruct((Mp, Np), out_dtype),
        grid_spec=pltpu.PrefetchScalarGridSpec(
            num_scalar_prefetch=0,
            grid=(Mp // tm, Np // tn, Kp // tk),
            in_specs=in_specs,
            out_specs=pl.BlockSpec((tm, tn), lambda i, j, k: (i, j)),
            scratch_shapes=[pltpu.VMEM((tm, tn), jnp.float32)],
        ),
        compiler_params=pltpu.CompilerParams(
            dimension_semantics=("parallel", "parallel", "arbitrary")),
    )(*ins)
    if (Mp, Np) != (M, N):
        out = out[:M, :N]
    return out


# ---------------------------------------------------------------------------
# Grouped 3x3 conv kernel: per output-channel chunk matmul + BN + ReLU.
# Weight for chunk j is only the (9*128, 128) block-diagonal slice that feeds
# those 128 output channels (groups never cross a chunk), so no width x width
# dense matrix is ever streamed or multiplied.
# ---------------------------------------------------------------------------
def _grouped_kernel(x_ref, w_ref, s_ref, b_ref, o_ref):
    acc = jnp.dot(x_ref[0], w_ref[0, 0], preferred_element_type=jnp.float32)
    out = jnp.maximum(acc * s_ref[0] + b_ref[0], 0.0)
    o_ref[0] = out.astype(o_ref.dtype)


def grouped_branch_matmul(cols, w, scale, bias, M, width, cc):
    """cols: (B, M, 9*width) chunk-major bf16; w: (B, nchunk, 9*cc, cc) bf16;
    scale/bias: (B, 1, width) f32.  Returns feats (B, M, width) bf16."""
    B = cols.shape[0]
    nchunk = width // cc
    kblk = 9 * cc
    tm = _tm(M)
    Mp = _round_up(M, tm)
    if Mp != M:
        cols = jnp.pad(cols, ((0, 0), (0, Mp - M), (0, 0)))

    out = pl.pallas_call(
        _grouped_kernel,
        out_shape=jax.ShapeDtypeStruct((B, Mp, width), jnp.bfloat16),
        grid_spec=pltpu.PrefetchScalarGridSpec(
            num_scalar_prefetch=0,
            grid=(B, Mp // tm, nchunk),
            in_specs=[
                pl.BlockSpec((1, tm, kblk), lambda b, i, j: (b, i, j)),
                pl.BlockSpec((1, 1, kblk, cc), lambda b, i, j: (b, j, 0, 0)),
                pl.BlockSpec((1, 1, cc), lambda b, i, j: (b, 0, j)),
                pl.BlockSpec((1, 1, cc), lambda b, i, j: (b, 0, j)),
            ],
            out_specs=pl.BlockSpec((1, tm, cc), lambda b, i, j: (b, i, j)),
        ),
        compiler_params=pltpu.CompilerParams(
            dimension_semantics=("parallel", "parallel", "parallel")),
    )(cols, w, scale, bias)
    return out[:, :M, :] if Mp != M else out


# ---------------------------------------------------------------------------
# im2col (data movement only; plain JAX glue, bf16)
# ---------------------------------------------------------------------------
def im2col(x, k, stride, padding, dilation):
    """x: (N,H,W,C) -> (N*Ho*Wo, k*k*C), tap-major / channel-minor (for stem)."""
    N, H, W, C = x.shape
    Ho = (H + 2 * padding - dilation * (k - 1) - 1) // stride + 1
    Wo = (W + 2 * padding - dilation * (k - 1) - 1) // stride + 1
    xp = jnp.pad(x, ((0, 0), (padding, padding), (padding, padding), (0, 0)))
    cols = []
    for i in range(k):
        for j in range(k):
            hs, ws = i * dilation, j * dilation
            cols.append(xp[:, hs:hs + (Ho - 1) * stride + 1:stride,
                           ws:ws + (Wo - 1) * stride + 1:stride, :])
    return jnp.concatenate(cols, -1).reshape(N * Ho * Wo, k * k * C), (Ho, Wo)


def im2col_chunked(x, stride, padding, dilation, cc):
    """Chunk-major im2col for the grouped 3x3 convs:
    (N,H,W,C) -> (N*Ho*Wo, (C//cc)*9*cc) laid out [chunk, tap, channel]."""
    # TODO(synk): fold this tap gather into the grouped kernel (direct conv with
    # element-offset index maps) to avoid the 9x HBM expansion of activations.
    N, H, W, C = x.shape
    Ho = (H + 2 * padding - dilation * 2 - 1) // stride + 1
    Wo = (W + 2 * padding - dilation * 2 - 1) // stride + 1
    xp = jnp.pad(x, ((0, 0), (padding, padding), (padding, padding), (0, 0)))
    nchunk = C // cc
    pieces = []
    for c in range(nchunk):
        for i in range(3):
            for j in range(3):
                hs, ws = i * dilation, j * dilation
                pieces.append(xp[:, hs:hs + (Ho - 1) * stride + 1:stride,
                                 ws:ws + (Wo - 1) * stride + 1:stride,
                                 c * cc:(c + 1) * cc])
    cols = jnp.concatenate(pieces, axis=-1)
    return cols.reshape(N * Ho * Wo, nchunk * 9 * cc), (Ho, Wo)


# ---------------------------------------------------------------------------
# Deterministic parameter construction (pre-padded, pre-cast at build time)
# ---------------------------------------------------------------------------
class ParamGen:
    def __init__(self, seed=0):
        self.rng = np.random.RandomState(seed)

    def dense_conv(self, cin, cout, k):
        std = math.sqrt(2.0 / (cout * k * k))                 # kaiming fan_out
        return self.rng.normal(0.0, std, (k * k * cin, cout)).astype(np.float32)

    def linear(self, cin, cout):
        bound = 1.0 / math.sqrt(cin)
        w = self.rng.uniform(-bound, bound, (cin, cout)).astype(np.float32)
        b = self.rng.uniform(-bound, bound, (cout,)).astype(np.float32)
        return w, b

    @staticmethod
    def bn(c):
        # eval-mode BatchNorm folded to (scale, bias); gamma=1, beta=0,
        # running_mean=0, running_var=1 (as in the reference init loop).
        scale = np.ones((c,), np.float32) / np.sqrt(1.0 + BN_EPS)
        bias = np.zeros((c,), np.float32)
        return scale, bias


def make_mm_params(w, scale, bias):
    """Pad weight/scale/bias to tile-aligned shapes once; cast weight to bf16."""
    K, N = w.shape
    Kp, Np = _round_up(K, _tk(K)), _round_up(N, _tn(N))
    wp = np.zeros((Kp, Np), np.float32); wp[:K, :N] = w
    sp = np.zeros((1, Np), np.float32);  sp[0, :N] = scale
    bp = np.zeros((1, Np), np.float32);  bp[0, :N] = bias
    return {"w": jnp.asarray(wp, jnp.bfloat16), "s": jnp.asarray(sp),
            "b": jnp.asarray(bp), "K": K, "N": N}


def build_block(pg, inplanes, planes, sk_groups, num_branchs, ratio, min_len,
                stride):
    # reference _make_layer hardcodes cardinality=32, base_width=4 in the block
    width = int(math.floor(planes * (4 / 64.0))) * 32
    d = max(width // ratio, min_len)
    outp = planes * EXPANSION
    cg = width // sk_groups
    cc = CHUNK if (width % CHUNK == 0 and CHUNK % cg == 0) else width

    p = {"stride": stride, "width": width, "out": outp, "cc": cc,
         "dilations": [1 + i for i in range(num_branchs)]}
    p["conv1"] = make_mm_params(pg.dense_conv(inplanes, width, 1), *pg.bn(width))

    # Grouped 3x3 branch weights, stored per output-channel chunk.
    std = math.sqrt(2.0 / (width * 9))
    nchunk, gpc = width // cc, cc // cg
    ws, ss, bs = [], [], []
    for _ in range(num_branchs):
        w = np.zeros((nchunk, 9, cc, cc), np.float32)
        for c in range(nchunk):
            for g in range(gpc):
                w[c, :, g * cg:(g + 1) * cg, g * cg:(g + 1) * cg] = \
                    pg.rng.normal(0.0, std, (9, cg, cg))
        ws.append(w.reshape(nchunk, 9 * cc, cc))
        s, b = pg.bn(width)
        ss.append(s.reshape(1, width)); bs.append(b.reshape(1, width))
    p["branch_w"] = jnp.asarray(np.stack(ws), jnp.bfloat16)
    p["branch_s"] = jnp.asarray(np.stack(ss))
    p["branch_b"] = jnp.asarray(np.stack(bs))

    p["fcz"] = make_mm_params(pg.dense_conv(width, d, 1), *pg.bn(d))
    # Per-branch attention FCs merged along N -> one matmul for all logits.
    fws, fbs = zip(*[pg.linear(d, width) for _ in range(num_branchs)])
    p["fcs"] = make_mm_params(np.concatenate(fws, axis=1),
                              np.ones(num_branchs * width, np.float32),
                              np.concatenate(fbs))
    p["conv3"] = make_mm_params(pg.dense_conv(width, outp, 1), *pg.bn(outp))

    p["downsample"] = None
    if stride != 1 or inplanes != outp:
        w = pg.dense_conv(inplanes, outp, 1)
        bound = 1.0 / math.sqrt(inplanes)
        b_conv = pg.rng.uniform(-bound, bound, (outp,)).astype(np.float32)
        s_bn, b_bn = pg.bn(outp)
        # fold conv bias into folded BN: y = (x@W + b_conv) * s + b
        p["downsample"] = make_mm_params(w, s_bn, b_bn + b_conv * s_bn)
    return p


def build_model(pg, blocks, sk_groups, num_branchs, ratio, min_len,
                cardinality, base_width, num_classes):
    params = {"stem": make_mm_params(pg.dense_conv(3, 64, 3), *pg.bn(64))}
    inplanes = 64
    layers = []
    for planes, nb, stride in zip([64, 128, 256, 512], blocks, [1, 2, 2, 2]):
        lyr = []
        s = stride
        for _ in range(nb):
            lyr.append(build_block(pg, inplanes, planes, sk_groups, num_branchs,
                                   ratio, min_len, s))
            inplanes = planes * EXPANSION
            s = 1
        layers.append(lyr)
    params["layers"] = layers
    wf, bf = pg.linear(512 * EXPANSION, num_classes)
    params["fc"] = make_mm_params(wf, np.ones(num_classes, np.float32), bf)
    return params


# ---------------------------------------------------------------------------
# Forward pass
# ---------------------------------------------------------------------------
def sk_block_forward(x, p):
    Nb, H, W, Cin = x.shape
    width, outp, stride, cc = p["width"], p["out"], p["stride"], p["cc"]

    # 1x1 conv + folded BN + ReLU
    out = fused_matmul(x.reshape(Nb * H * W, Cin), p["conv1"], relu=True)
    out = out.reshape(Nb, H, W, width)

    # Grouped 3x3 branches: both branches and all channel chunks in ONE call.
    cols = []
    Ho = Wo = None
    for dil in p["dilations"]:
        c, (Ho, Wo) = im2col_chunked(out, stride, dil, dil, cc)
        cols.append(c)
    cols = jnp.stack(cols, axis=0)                         # (B, M, 9*width)
    M = Nb * Ho * Wo
    feats = grouped_branch_matmul(cols, p["branch_w"], p["branch_s"],
                                  p["branch_b"], M, width, cc)  # (B, M, width)
    B = feats.shape[0]

    # SK attention (tiny, M == batch). U = sum(feats) is never materialized:
    # its global average pool is one fused JAX reduce of the branch outputs.
    s_vec = feats.astype(jnp.float32).sum(0).reshape(Nb, Ho * Wo, width).mean(1)
    z = fused_matmul(s_vec, p["fcz"], relu=True)                 # (Nb, d)
    logits = fused_matmul(z, p["fcs"], out_dtype=jnp.float32)    # (Nb, B*width)
    att = jax.nn.softmax(logits.reshape(Nb, B, width), axis=1)   # (Nb, B, width)

    # V = sum_b att_b * feat_b
    # TODO(synk): fold this weighted combine into the conv3 kernel's K loop so V
    # never round-trips through HBM.
    featsf = feats.reshape(B, Nb, Ho * Wo, width).astype(jnp.float32)
    V = jnp.einsum('bnpc,nbc->npc', featsf, att).reshape(M, width)

    if p["downsample"] is not None:
        ident = x[:, ::stride, ::stride, :].reshape(M, Cin)
        ident = fused_matmul(ident, p["downsample"])    # 1x1 strided conv + BN
    else:
        ident = x.reshape(M, Cin)                       # bf16 residual

    out = fused_matmul(V, p["conv3"], residual=ident, relu=True)
    return out.reshape(Nb, Ho, Wo, outp)


def skresnext_forward(x_nchw, params):
    x = jnp.transpose(x_nchw, (0, 2, 3, 1)).astype(jnp.bfloat16)  # NCHW -> NHWC
    Nb = x.shape[0]
    cols, (Ho, Wo) = im2col(x, 3, 1, 1, 1)
    x = fused_matmul(cols, params["stem"], relu=True).reshape(Nb, Ho, Wo, 64)
    for lyr in params["layers"]:
        for blk in lyr:
            x = sk_block_forward(x, blk)
    pooled = jnp.mean(x.astype(jnp.float32), axis=(1, 2))  # AdaptiveAvgPool+flatten
    return fused_matmul(pooled, params["fc"], out_dtype=jnp.float32)


if __name__ == "__main__":
    pg = ParamGen(0)
    params = build_model(pg, blocks=[1, 1, 1, 1], sk_groups=32, num_branchs=2,
                         ratio=16, min_len=32, cardinality=32, base_width=4,
                         num_classes=16)
    key = jax.random.PRNGKey(0)
    x = jax.random.normal(key, (2, 3, 16, 16), dtype=jnp.float32)
    out = skresnext_forward(x, params)
    out = jax.block_until_ready(out)
    assert out.shape == (2, 16) and bool(jnp.all(jnp.isfinite(out)))
    print("KERNEL_OK")
</pallas_src>

<mosaic_0001>
module attributes {stable_mosaic.version = 11 : i64} {
  func.func @kernel(%arg0: i32, %arg1: i32, %arg2: i32, %arg3: memref<512x128xbf16, #tpu.memory_space<vmem>>, %arg4: memref<128x128xbf16, #tpu.memory_space<vmem>>, %arg5: memref<1x128xf32, #tpu.memory_space<vmem>>, %arg6: memref<1x128xf32, #tpu.memory_space<vmem>>, %arg7: memref<512x128xbf16, #tpu.memory_space<vmem>>, %arg8: memref<512x128xf32, #tpu.memory_space<vmem>>) attributes {dimension_semantics = [#tpu.dimension_semantics<parallel>, #tpu.dimension_semantics<parallel>, #tpu.dimension_semantics<arbitrary>], iteration_bounds = array<i64: 1, 1, 1>, scalar_prefetch = 0 : i64, scratch_operands = 1 : i64, tpu.core_type = #tpu.core_type<tc>, window_params = [{transform_indices = @transform_0, window_bounds = array<i64: 512, 128>}, {transform_indices = @transform_1, window_bounds = array<i64: 128, 128>}, {transform_indices = @transform_2, window_bounds = array<i64: 1, 128>}, {transform_indices = @transform_3, window_bounds = array<i64: 1, 128>}, {transform_indices = @transform_4, window_bounds = array<i64: 512, 128>}]} {
    %c0_i32 = arith.constant 0 : i32
    %0 = arith.cmpi eq, %arg2, %c0_i32 : i32
    %1 = arith.extui %0 : i1 to i32
    %c0_i32_0 = arith.constant 0 : i32
    %2 = arith.cmpi ne, %1, %c0_i32_0 : i32
    scf.if %2 {
      %cst_10 = arith.constant 0.000000e+00 : f32
      %12 = vector.broadcast %cst_10 : f32 to vector<512x128xf32>
      %c0_11 = arith.constant 0 : index
      %c0_12 = arith.constant 0 : index
      %13 = vector.load %arg8[%c0_11, %c0_12] : memref<512x128xf32, #tpu.memory_space<vmem>>, vector<512x128xf32>
      tpu.vector_store %arg8[%c0_11, %c0_12], %12 {strides = array<i32>} : memref<512x128xf32, #tpu.memory_space<vmem>>, vector<512x128xf32>,
    } else {
    }
    %c0 = arith.constant 0 : index
    %c0_1 = arith.constant 0 : index
    %3 = vector.load %arg8[%c0, %c0_1] : memref<512x128xf32, #tpu.memory_space<vmem>>, vector<512x128xf32>
    %c0_2 = arith.constant 0 : index
    %c0_3 = arith.constant 0 : index
    %4 = vector.load %arg3[%c0_2, %c0_3] : memref<512x128xbf16, #tpu.memory_space<vmem>>, vector<512x128xbf16>
    %c0_4 = arith.constant 0 : index
    %c0_5 = arith.constant 0 : index
    %5 = vector.load %arg4[%c0_4, %c0_5] : memref<128x128xbf16, #tpu.memory_space<vmem>>, vector<128x128xbf16>
    %cst = arith.constant dense<0.000000e+00> : vector<512x128xf32>
    %6 = tpu.matmul %4, %5, %cst {dimension_numbers = #tpu.dot_dimension_numbers<[1], [0], [0], [1], [0, 0, 1, 1], [], []>} : vector<512x128xbf16>, vector<128x128xbf16>, vector<512x128xf32> -> vector<512x128xf32>
    %7 = arith.addf %3, %6 : vector<512x128xf32>
    %c0_6 = arith.constant 0 : index
    %c0_7 = arith.constant 0 : index
    %8 = vector.load %arg8[%c0_6, %c0_7] : memref<512x128xf32, #tpu.memory_space<vmem>>, vector<512x128xf32>
    tpu.vector_store %arg8[%c0_6, %c0_7], %7 {strides = array<i32>} : memref<512x128xf32, #tpu.memory_space<vmem>>, vector<512x128xf32>,
    %c0_i32_8 = arith.constant 0 : i32
    %9 = arith.cmpi eq, %arg2, %c0_i32_8 : i32
    %10 = arith.extui %9 : i1 to i32
    %c0_i32_9 = arith.constant 0 : i32
    %11 = arith.cmpi ne, %10, %c0_i32_9 : i32
    scf.if %11 {
      %c0_10 = arith.constant 0 : index
      %c0_11 = arith.constant 0 : index
      %12 = vector.load %arg8[%c0_10, %c0_11] : memref<512x128xf32, #tpu.memory_space<vmem>>, vector<512x128xf32>
      %c0_12 = arith.constant 0 : index
      %c0_13 = arith.constant 0 : index
      %13 = vector.load %arg5[%c0_12, %c0_13] : memref<1x128xf32, #tpu.memory_space<vmem>>, vector<1x128xf32>
      %14 = vector.broadcast %13 : vector<1x128xf32> to vector<512x128xf32>
      %15 = arith.mulf %12, %14 : vector<512x128xf32>
      %c0_14 = arith.constant 0 : index
      %c0_15 = arith.constant 0 : index
      %16 = vector.load %arg6[%c0_14, %c0_15] : memref<1x128xf32, #tpu.memory_space<vmem>>, vector<1x128xf32>
      %17 = vector.broadcast %16 : vector<1x128xf32> to vector<512x128xf32>
      %18 = arith.addf %15, %17 : vector<512x128xf32>
      %cst_16 = arith.constant 0.000000e+00 : f32
      %19 = vector.broadcast %cst_16 : f32 to vector<512x128xf32>
      %20 = arith.maximumf %18, %19 : vector<512x128xf32>
      %21 = arith.truncf %20 : vector<512x128xf32> to vector<512x128xbf16>
      %c0_17 = arith.constant 0 : index
      %c0_18 = arith.constant 0 : index
      %22 = vector.load %arg7[%c0_17, %c0_18] : memref<512x128xbf16, #tpu.memory_space<vmem>>, vector<512x128xbf16>
      tpu.vector_store %arg7[%c0_17, %c0_18], %21 {strides = array<i32>} : memref<512x128xbf16, #tpu.memory_space<vmem>>, vector<512x128xbf16>,
    } else {
    }
    return
  }
  func.func @transform_0(%arg0: i32, %arg1: i32, %arg2: i32) -> (i32, i32) {
    %c0_i32 = arith.constant 0 : i32
    return %arg0, %arg2 : i32, i32
  }
  func.func @transform_1(%arg0: i32, %arg1: i32, %arg2: i32) -> (i32, i32) {
    %c0_i32 = arith.constant 0 : i32
    return %arg2, %arg1 : i32, i32
  }
  func.func @transform_2(%arg0: i32, %arg1: i32, %arg2: i32) -> (i32, i32) {
    %c0_i32 = arith.constant 0 : i32
    %c0_i32_0 = arith.constant 0 : i32
    return %c0_i32, %arg1 : i32, i32
  }
  func.func @transform_3(%arg0: i32, %arg1: i32, %arg2: i32) -> (i32, i32) {
    %c0_i32 = arith.constant 0 : i32
    %c0_i32_0 = arith.constant 0 : i32
    return %c0_i32, %arg1 : i32, i32
  }
  func.func @transform_4(%arg0: i32, %arg1: i32, %arg2: i32) -> (i32, i32) {
    %c0_i32 = arith.constant 0 : i32
    return %arg0, %arg1 : i32, i32
  }
}

</mosaic_0001>

<bundles_post_ra>
// kernel: tpu_custom_call.1
= control target key start
LH: loop header
LB: loop body
LE: loop exit
PB: predicated region body
PF: predicated region fallthrough
CT: control target
= control target key end

     0   :  { %9 = vsyncpa [#allocation4], 0  ;;  %s2321_s0 = inlined_call_operand.hbm [shape: bf16[512,128], index: 0, kind: input, shape index: {}]   ;;  %s2322_s1 = inlined_call_operand.hbm [shape: bf16[128,128], index: 1, kind: input, shape index: {}]   ;;  %s2323_s2 = inlined_call_operand.vmem [shape: f32[1,128], index: 2, kind: input, shape index: {}]   ;;  %s2324_s3 = inlined_call_operand.vmem [shape: f32[1,128], index: 3, kind: input, shape index: {}]   ;;  %s2325_s4 = inlined_call_operand.hbm [shape: bf16[512,128], index: 4, kind: output, shape index: {}]  }
   0x1   :  { %10 = vsyncpa [#allocation7], 0 }
   0x2   :  { %11 = vsyncpa [#allocation5], 0  ;;  %s2135_s15 = smov [#allocation3]  }
   0x3   :  { %s17_s16 = sshll.u32 %s2135_s15, 4  ;;  %s18_s16 = int_to_ptr.vmem [resolvable:$true] %s17_s16 }
   0x4   :  { %s2077_s17 = scalar_lea.vmem %s18_s16, 4096  ;;  %p2082_p1 = scmp.lt.s32.totalorder %s18_s16, %s18_s16 }
   0x5   :  { %p2078_p0 = scmp.ne.s32.totalorder %s18_s16, %s2077_s17  ;;  %p2083_p2 = scmp.lt.s32.totalorder %s2077_s17, %s2077_s17 }
   0x7   :  { %p2084_p3 = por %p2083_p2, %p2082_p1 }
   0x9   :  { %p2085_p4 = pnand %p2084_p3, %p2078_p0 }
   0xb   :  { %2088 = shalt.err (!%p2085_p4)
}
   0xc   :  { %s2136_s18 = smov 64   ;;  %s2137_s19 = smov 4  }
   0xd   :  { %23 = dma.hbm_to_vmem [thread:$0]  %s2321_s0, 4096, %s18_s16, [#allocation4], %s2136_s18, %s2136_s18, %s2137_s19  }
   0xe   :  { %s2138_s22 = smov [#allocation6]  }
   0xf   :  { %s29_s23 = sshll.u32 %s2138_s22, 4  ;;  %s30_s23 = int_to_ptr.vmem [resolvable:$true] %s29_s23 }
  0x10   :  { %s2097_s24 = scalar_lea.vmem %s30_s23, 1024  ;;  %p2102_p6 = scmp.lt.s32.totalorder %s30_s23, %s30_s23 }
  0x11   :  { %p2098_p5 = scmp.ne.s32.totalorder %s30_s23, %s2097_s24  ;;  %p2103_p7 = scmp.lt.s32.totalorder %s2097_s24, %s2097_s24 }
  0x13   :  { %p2104_p8 = por %p2103_p7, %p2102_p6 }
  0x15   :  { %p2105_p9 = pnand %p2104_p8, %p2098_p5 }
  0x17   :  { %2108 = shalt.err (!%p2105_p9)
}
  0x18   :  { %35 = dma.hbm_to_vmem [thread:$0]  %s2322_s1, 1024, %s30_s23, [#allocation7], %s2136_s18, %s2136_s18, %s2137_s19  }
  0x19   :  { %2129 = dma.done.wait [#allocation4], 4096  }
  0x1a   :  { %2130 = vsyncadd [#allocation4], 4294963200 }
  0x1b   :  { %2131 = dma.done.wait [#allocation7], 1024  }
  0x1c   :  { %2132 = vsyncadd [#allocation7], 4294966272  ;;  %v2029_v0 = vld [vmem:[#allocation6 + $0x38] sm:$0xff]   ;;  %v2030_v1 = vld [vmem:[#allocation6 + $0x30] sm:$0xff]  }
  0x1d   :  { %1928 = vmatprep.subr.bf16.mxu0 %v2029_v0  ;;  %2008 = vmatprep.subr.bf16.mxu1 %v2029_v0  ;;  %v2031_v2 = vld [vmem:[#allocation6 + $0x28] sm:$0xff]   ;;  %v2032_v3 = vld [vmem:[#allocation6 + $0x20] sm:$0xff]   ;;  %v2033_v6 = vld [vmem:[#allocation6 + $0x18] sm:$0xff]  }
  0x1e   :  { %1929 = vmatpush3.bf16.msra.mxu0 %v2029_v0  ;;  %2016 = vmatpush3.bf16.msra.mxu1 %v2029_v0  ;;  %v2037_v4 = vld [vmem:[#allocation3] sm:$0xff]   ;;  %v2034_v7 = vld [vmem:[#allocation6 + $0x10] sm:$0xff]   ;;  %v2035_v8 = vld [vmem:[#allocation6 + $0x8] sm:$0xff]  }
  0x1f   :  { %1930 = vmatprep.subr.bf16.mxu0 %v2030_v1  ;;  %2009 = vmatprep.subr.bf16.mxu1 %v2030_v1  ;;  %v2038_v5 = vld [vmem:[#allocation3 + $0x80] sm:$0xff]   ;;  %v2039_v10 = vld [vmem:[#allocation3 + $0x8] sm:$0xff]   ;;  %v2041_v12 = vld [vmem:[#allocation3 + $0x10] sm:$0xff]  }
  0x20   :  { %1944 = vmatprep.mubr.bf16.mxu0 %v2037_v4  ;;  %1976 = vmatprep.mubr.bf16.mxu1 %v2038_v5  ;;  %v2036_v9 = vld [vmem:[#allocation6] sm:$0xff]   ;;  %v2040_v11 = vld [vmem:[#allocation3 + $0x88] sm:$0xff]   ;;  %v2042_v13 = vld [vmem:[#allocation3 + $0x90] sm:$0xff]  }
  0x21   :  { %v2043_v14 = vld [vmem:[#allocation3 + $0x18] sm:$0xff]   ;;  %v2045_v16 = vld [vmem:[#allocation3 + $0x20] sm:$0xff]   ;;  %v2047_v18 = vld [vmem:[#allocation3 + $0x28] sm:$0xff]  }
  0x22   :  { %1931 = vmatpush3.bf16.msra.mxu0 %v2030_v1  ;;  %2017 = vmatpush3.bf16.msra.mxu1 %v2030_v1  ;;  %v2044_v15 = vld [vmem:[#allocation3 + $0x98] sm:$0xff]   ;;  %v2046_v17 = vld [vmem:[#allocation3 + $0xa0] sm:$0xff]   ;;  %v2048_v19 = vld [vmem:[#allocation3 + $0xa8] sm:$0xff]  }
  0x23   :  { %1932 = vmatprep.subr.bf16.mxu0 %v2031_v2  ;;  %2010 = vmatprep.subr.bf16.mxu1 %v2031_v2  ;;  %v2049_v20 = vld [vmem:[#allocation3 + $0x30] sm:$0xff]   ;;  %v2051_v22 = vld [vmem:[#allocation3 + $0x38] sm:$0xff]   ;;  %v2053_v24 = vld [vmem:[#allocation3 + $0x40] sm:$0xff]  }
  0x24   :  { %v2050_v21 = vld [vmem:[#allocation3 + $0xb0] sm:$0xff]   ;;  %v2052_v23 = vld [vmem:[#allocation3 + $0xb8] sm:$0xff]   ;;  %v2054_v25 = vld [vmem:[#allocation3 + $0xc0] sm:$0xff]  }
  0x25   :  { %v2055_v26 = vld [vmem:[#allocation3 + $0x48] sm:$0xff]   ;;  %v2057_v28 = vld [vmem:[#allocation3 + $0x50] sm:$0xff]   ;;  %v2059_v30 = vld [vmem:[#allocation3 + $0x58] sm:$0xff]  }
  0x26   :  { %1933 = vmatpush3.bf16.msra.mxu0 %v2031_v2  ;;  %2018 = vmatpush3.bf16.msra.mxu1 %v2031_v2  ;;  %v2056_v27 = vld [vmem:[#allocation3 + $0xc8] sm:$0xff]   ;;  %v2058_v29 = vld [vmem:[#allocation3 + $0xd0] sm:$0xff]   ;;  %v2060_v31 = vld [vmem:[#allocation3 + $0xd8] sm:$0xff]  }
  0x27   :  { %1934 = vmatprep.subr.bf16.mxu0 %v2032_v3  ;;  %2011 = vmatprep.subr.bf16.mxu1 %v2032_v3  ;;  %v2061_v32 = vld [vmem:[#allocation3 + $0x60] sm:$0xff]   ;;  %v2063_v34 = vld [vmem:[#allocation3 + $0x68] sm:$0xff]   ;;  %v2065_v36 = vld [vmem:[#allocation3 + $0x70] sm:$0xff]  }
  0x28   :  { %v2062_v33 = vld [vmem:[#allocation3 + $0xe0] sm:$0xff]   ;;  %v2064_v35 = vld [vmem:[#allocation3 + $0xe8] sm:$0xff]   ;;  %v2066_v37 = vld [vmem:[#allocation3 + $0xf0] sm:$0xff]  }
  0x29   :  { %v2067_v38 = vld [vmem:[#allocation3 + $0x78] sm:$0xff]   ;;  %v2180_v40 = vld [vmem:[%s2323_s2] ss:$0 sm:$0xff]  ;;  %s2139_s2 = smov [#allocation8]  }
  0x2a   :  { %1935 = vmatpush3.bf16.msra.mxu0 %v2032_v3  ;;  %2019 = vmatpush3.bf16.msra.mxu1 %v2032_v3  ;;  %v2068_v39 = vld [vmem:[#allocation3 + $0xf8] sm:$0xff]   ;;  %v2187_v45 = vld [vmem:[%s2324_s3] ss:$0 sm:$0xff]  ;;  %s1514_s3 = sshll.u32 %s2139_s2, 4  ;;  %s1515_s3 = int_to_ptr.vmem [resolvable:$true] %s1514_s3 }
  0x2b   :  { %1936 = vmatprep.subr.bf16.mxu0 %v2033_v6  ;;  %2012 = vmatprep.subr.bf16.mxu1 %v2033_v6  ;;  %s2109_s29 = scalar_lea.vmem %s1515_s3, 4096  ;;  %p2114_p11 = scmp.lt.s32.totalorder %s1515_s3, %s1515_s3 }
  0x2c   :  { %p2110_p10 = scmp.ne.s32.totalorder %s1515_s3, %s2109_s29  ;;  %p2115_p12 = scmp.lt.s32.totalorder %s2109_s29, %s2109_s29 }
  0x2e   :  { %1937 = vmatpush3.bf16.msra.mxu0 %v2033_v6  ;;  %2020 = vmatpush3.bf16.msra.mxu1 %v2033_v6  ;;  %p2116_p13 = por %p2115_p12, %p2114_p11 }
  0x2f   :  { %1938 = vmatprep.subr.bf16.mxu0 %v2034_v7  ;;  %2013 = vmatprep.subr.bf16.mxu1 %v2034_v7 }
  0x30   :  { %p2117_p0 = pnand %p2116_p13, %p2110_p10 }
  0x32   :  { %1939 = vmatpush3.bf16.msra.mxu0 %v2034_v7  ;;  %2021 = vmatpush3.bf16.msra.mxu1 %v2034_v7 }
  0x33   :  { %1940 = vmatprep.subr.bf16.mxu0 %v2035_v8  ;;  %2014 = vmatprep.subr.bf16.mxu1 %v2035_v8 }
  0x36   :  { %1941 = vmatpush3.bf16.msra.mxu0 %v2035_v8  ;;  %2022 = vmatpush3.bf16.msra.mxu1 %v2035_v8 }
  0x37   :  { %1942 = vmatprep.subr.bf16.mxu0 %v2036_v9  ;;  %2015 = vmatprep.subr.bf16.mxu1 %v2036_v9 }
  0x3a   :  { %1943 = vmatpush3.bf16.msra.mxu0 %v2036_v9  ;;  %2023 = vmatpush3.bf16.msra.mxu1 %v2036_v9 }
  0x3d   :  { %1945 = vmatmul.mubr.bf16.vlgmr.msra.gmra.mxu0 %v2039_v10  ;;  %1977 = vmatmul.mubr.bf16.vlgmr.msra.gmra.mxu1 %v2040_v11 }
  0x3e   :  { %1948 = vmatprep.mubr.bf16.mxu0 %v2041_v12  ;;  %1980 = vmatprep.mubr.bf16.mxu1 %v2042_v13 }
  0x45   :  { %1949 = vmatmul.mubr.bf16.gmra.mxu0 %v2043_v14  ;;  %1981 = vmatmul.mubr.bf16.gmra.mxu1 %v2044_v15 }
  0x46   :  { %1952 = vmatprep.mubr.bf16.mxu0 %v2045_v16  ;;  %1984 = vmatprep.mubr.bf16.mxu1 %v2046_v17 }
  0x4d   :  { %1953 = vmatmul.mubr.bf16.gmra.mxu0 %v2047_v18  ;;  %1985 = vmatmul.mubr.bf16.gmra.mxu1 %v2048_v19 }
  0x4e   :  { %1956 = vmatprep.mubr.bf16.mxu0 %v2049_v20  ;;  %1988 = vmatprep.mubr.bf16.mxu1 %v2050_v21 }
  0x55   :  { %1957 = vmatmul.mubr.bf16.gmra.mxu0 %v2051_v22  ;;  %1989 = vmatmul.mubr.bf16.gmra.mxu1 %v2052_v23 }
  0x56   :  { %1960 = vmatprep.mubr.bf16.mxu0 %v2053_v24  ;;  %1992 = vmatprep.mubr.bf16.mxu1 %v2054_v25 }
  0x5d   :  { %1961 = vmatmul.mubr.bf16.gmra.mxu0 %v2055_v26  ;;  %1993 = vmatmul.mubr.bf16.gmra.mxu1 %v2056_v27 }
  0x5e   :  { %1964 = vmatprep.mubr.bf16.mxu0 %v2057_v28  ;;  %1996 = vmatprep.mubr.bf16.mxu1 %v2058_v29 }
  0x65   :  { %1965 = vmatmul.mubr.bf16.gmra.mxu0 %v2059_v30  ;;  %1997 = vmatmul.mubr.bf16.gmra.mxu1 %v2060_v31 }
  0x66   :  { %1968 = vmatprep.mubr.bf16.mxu0 %v2061_v32  ;;  %2000 = vmatprep.mubr.bf16.mxu1 %v2062_v33 }
  0x6d   :  { %1969 = vmatmul.mubr.bf16.gmra.mxu0 %v2063_v34  ;;  %2001 = vmatmul.mubr.bf16.gmra.mxu1 %v2064_v35 }
  0x6e   :  { %1972 = vmatprep.mubr.bf16.mxu0 %v2065_v36  ;;  %2004 = vmatprep.mubr.bf16.mxu1 %v2066_v37 }
  0x75   :  { %1973 = vmatmul.mubr.bf16.gmra.mxu0 %v2067_v38  ;;  %2005 = vmatmul.mubr.bf16.gmra.mxu1 %v2068_v39 }
  0xfd   :  { %v1946_v41 = vpop.f32.mrf.mxu0  ;;  %v1978_v42 = vpop.f32.mrf.mxu1 }
  0xfe   :  { %v992_v43 = vmul.f32 %v1946_v41, %v2180_v40  ;;  %v1024_v44 = vmul.f32 %v1978_v42, %v2180_v40 }
  0xff   :  { %v533_v46 = vpop.f32.mrf.mxu0  ;;  %v661_v47 = vpop.f32.mrf.mxu1 }
 0x100   :  { %v990_v48 = vmul.f32 %v2180_v40, %v533_v46  ;;  %v1022_v49 = vmul.f32 %v2180_v40, %v661_v47  ;;  %v1063_v52 = vadd.f32 %v2187_v45, %v992_v43  ;;  %v1095_v53 = vadd.f32 %v2187_v45, %v1024_v44 }
 0x101   :  { %v1947_v50 = vpop.f32.mrf.mxu0  ;;  %v1979_v51 = vpop.f32.mrf.mxu1 }
 0x102   :  { %v993_v54 = vmul.f32 %v1947_v50, %v2180_v40  ;;  %v1025_v55 = vmul.f32 %v1979_v51, %v2180_v40  ;;  %v1061_v58 = vadd.f32 %v2187_v45, %v990_v48  ;;  %v1093_v59 = vadd.f32 %v2187_v45, %v1022_v49 }
 0x103   :  { %v536_v56 = vpop.f32.mrf.mxu0  ;;  %v664_v57 = vpop.f32.mrf.mxu1  ;;  %v1127_v2 = vmax.f32 %v1063_v52, 0.0  ;;  %v1159_v3 = vmax.f32 %v1095_v53, 0.0 }
 0x104   :  { %v991_v60 = vmul.f32 %v2180_v40, %v536_v56  ;;  %v1023_v61 = vmul.f32 %v2180_v40, %v664_v57  ;;  %v1064_v62 = vadd.f32 %v2187_v45, %v993_v54  ;;  %v1096_v63 = vadd.f32 %v2187_v45, %v1025_v55 }
 0x105   :  { %v1950_v0 = vpop.f32.mrf.mxu0  ;;  %v1982_v1 = vpop.f32.mrf.mxu1  ;;  %v1125_v12 = vmax.f32 %v1061_v58, 0.0  ;;  %v1157_v13 = vmax.f32 %v1093_v59, 0.0 }
 0x106   :  { %v1062_v4 = vadd.f32 %v2187_v45, %v991_v60  ;;  %v1094_v5 = vadd.f32 %v2187_v45, %v1023_v61  ;;  %v1128_v6 = vmax.f32 %v1064_v62, 0.0  ;;  %v1160_v7 = vmax.f32 %v1096_v63, 0.0 }
 0x107   :  { %v996_v8 = vmul.f32 %v1950_v0, %v2180_v40  ;;  %v1028_v9 = vmul.f32 %v1982_v1, %v2180_v40  ;;  %v549_v10 = vpop.f32.mrf.mxu0  ;;  %v677_v11 = vpop.f32.mrf.mxu1 }
 0x108   :  { %v1126_v14 = vmax.f32 %v1062_v4, 0.0  ;;  %v1158_v15 = vmax.f32 %v1094_v5, 0.0  ;;  %v1705_v16 = vpack.c.bf16 %v1128_v6, %v1127_v2  ;;  %v1785_v17 = vpack.c.bf16 %v1160_v7, %v1159_v3 }
 0x109   :  { %v994_v18 = vmul.f32 %v2180_v40, %v549_v10  ;;  %v1026_v19 = vmul.f32 %v2180_v40, %v677_v11  ;;  %v1951_v20 = vpop.f32.mrf.mxu0  ;;  %v1983_v21 = vpop.f32.mrf.mxu1  ;;  %v1067_v24 = vadd.f32 %v2187_v45, %v996_v8  ;;  %v1099_v25 = vadd.f32 %v2187_v45, %v1028_v9 }
 0x10a   :  { %v1700_v22 = vpack.c.bf16 %v1126_v14, %v1125_v12  ;;  %v1780_v23 = vpack.c.bf16 %v1158_v15, %v1157_v13  ;;  %1857 = vst [vmem:[#allocation8 + $0x8] sm:$0xff] %v1705_v16   ;;  %1873 = vst [vmem:[#allocation8 + $0x88] sm:$0xff] %v1785_v17   ;;  %v997_v26 = vmul.f32 %v1951_v20, %v2180_v40 }
 0x10b   :  { %v1029_v27 = vmul.f32 %v1983_v21, %v2180_v40  ;;  %v552_v28 = vpop.f32.mrf.mxu0  ;;  %v680_v29 = vpop.f32.mrf.mxu1  ;;  %v1065_v30 = vadd.f32 %v2187_v45, %v994_v18  ;;  %v1097_v31 = vadd.f32 %v2187_v45, %v1026_v19  ;;  %v1131_v43 = vmax.f32 %v1067_v24, 0.0 }
 0x10c   :  { %1701 = vst [vmem:[#allocation8] sm:$0xff] %v1700_v22   ;;  %1872 = vst [vmem:[#allocation8 + $0x80] sm:$0xff] %v1780_v23   ;;  %v995_v32 = vmul.f32 %v2180_v40, %v552_v28  ;;  %v1027_v33 = vmul.f32 %v2180_v40, %v680_v29  ;;  %v1068_v34 = vadd.f32 %v2187_v45, %v997_v26  ;;  %v1163_v44 = vmax.f32 %v1099_v25, 0.0 }
 0x10d   :  { %v1100_v35 = vadd.f32 %v2187_v45, %v1029_v27  ;;  %v1954_v36 = vpop.f32.mrf.mxu0  ;;  %v1986_v37 = vpop.f32.mrf.mxu1  ;;  %v1129_v50 = vmax.f32 %v1065_v30, 0.0  ;;  %v1161_v51 = vmax.f32 %v1097_v31, 0.0 }
 0x10e   :  { %v1066_v38 = vadd.f32 %v2187_v45, %v995_v32  ;;  %v1098_v39 = vadd.f32 %v2187_v45, %v1027_v33  ;;  %v1000_v41 = vmul.f32 %v1954_v36, %v2180_v40  ;;  %v1032_v42 = vmul.f32 %v1986_v37, %v2180_v40 }
 0x10f   :  { %v1132_v46 = vmax.f32 %v1068_v34, 0.0  ;;  %v1164_v47 = vmax.f32 %v1100_v35, 0.0  ;;  %v565_v48 = vpop.f32.mrf.mxu0  ;;  %v693_v49 = vpop.f32.mrf.mxu1 }
 0x110   :  { %v1130_v52 = vmax.f32 %v1066_v38, 0.0  ;;  %v1162_v53 = vmax.f32 %v1098_v39, 0.0  ;;  %v998_v56 = vmul.f32 %v2180_v40, %v565_v48  ;;  %v1030_v57 = vmul.f32 %v2180_v40, %v693_v49 }
 0x111   :  { %v1715_v54 = vpack.c.bf16 %v1132_v46, %v1131_v43  ;;  %v1795_v55 = vpack.c.bf16 %v1164_v47, %v1163_v44  ;;  %v1955_v58 = vpop.f32.mrf.mxu0  ;;  %v1987_v59 = vpop.f32.mrf.mxu1  ;;  %v1071_v62 = vadd.f32 %v2187_v45, %v1000_v41  ;;  %v1103_v63 = vadd.f32 %v2187_v45, %v1032_v42 }
 0x112   :  { %v1710_v60 = vpack.c.bf16 %v1130_v52, %v1129_v50  ;;  %v1790_v61 = vpack.c.bf16 %v1162_v53, %v1161_v51  ;;  %v1001_v0 = vmul.f32 %v1955_v58, %v2180_v40  ;;  %v1033_v1 = vmul.f32 %v1987_v59, %v2180_v40 }
 0x113   :  { %1859 = vst [vmem:[#allocation8 + $0x18] sm:$0xff] %v1715_v54   ;;  %1875 = vst [vmem:[#allocation8 + $0x98] sm:$0xff] %v1795_v55   ;;  %v568_v2 = vpop.f32.mrf.mxu0  ;;  %v696_v3 = vpop.f32.mrf.mxu1  ;;  %v1069_v4 = vadd.f32 %v2187_v45, %v998_v56  ;;  %v1101_v5 = vadd.f32 %v2187_v45, %v1030_v57  ;;  %v1135_v12 = vmax.f32 %v1071_v62, 0.0  ;;  %v1167_v13 = vmax.f32 %v1103_v63, 0.0 }
 0x114   :  { %1858 = vst [vmem:[#allocation8 + $0x10] sm:$0xff] %v1710_v60   ;;  %1874 = vst [vmem:[#allocation8 + $0x90] sm:$0xff] %v1790_v61   ;;  %v999_v6 = vmul.f32 %v2180_v40, %v568_v2  ;;  %v1031_v7 = vmul.f32 %v2180_v40, %v696_v3  ;;  %v1072_v8 = vadd.f32 %v2187_v45, %v1001_v0 }
 0x115   :  { %v1104_v9 = vadd.f32 %v2187_v45, %v1033_v1  ;;  %v1958_v10 = vpop.f32.mrf.mxu0  ;;  %v1990_v11 = vpop.f32.mrf.mxu1  ;;  %v1133_v22 = vmax.f32 %v1069_v4, 0.0  ;;  %v1165_v23 = vmax.f32 %v1101_v5, 0.0 }
 0x116   :  { %v1070_v14 = vadd.f32 %v2187_v45, %v999_v6  ;;  %v1102_v15 = vadd.f32 %v2187_v45, %v1031_v7  ;;  %v1136_v16 = vmax.f32 %v1072_v8, 0.0  ;;  %v1004_v18 = vmul.f32 %v1958_v10, %v2180_v40 }
 0x117   :  { %v1168_v17 = vmax.f32 %v1104_v9, 0.0  ;;  %v1036_v19 = vmul.f32 %v1990_v11, %v2180_v40  ;;  %v581_v20 = vpop.f32.mrf.mxu0  ;;  %v709_v21 = vpop.f32.mrf.mxu1 }
 0x118   :  { %v1134_v24 = vmax.f32 %v1070_v14, 0.0  ;;  %v1166_v25 = vmax.f32 %v1102_v15, 0.0  ;;  %v1725_v26 = vpack.c.bf16 %v1136_v16, %v1135_v12  ;;  %v1002_v28 = vmul.f32 %v2180_v40, %v581_v20 }
 0x119   :  { %v1805_v27 = vpack.c.bf16 %v1168_v17, %v1167_v13  ;;  %v1034_v29 = vmul.f32 %v2180_v40, %v709_v21  ;;  %v1959_v30 = vpop.f32.mrf.mxu0  ;;  %v1991_v31 = vpop.f32.mrf.mxu1  ;;  %v1075_v34 = vadd.f32 %v2187_v45, %v1004_v18  ;;  %v1107_v35 = vadd.f32 %v2187_v45, %v1036_v19 }
 0x11a   :  { %v1720_v32 = vpack.c.bf16 %v1134_v24, %v1133_v22  ;;  %v1800_v33 = vpack.c.bf16 %v1166_v25, %v1165_v23  ;;  %1861 = vst [vmem:[#allocation8 + $0x28] sm:$0xff] %v1725_v26   ;;  %v1005_v36 = vmul.f32 %v1959_v30, %v2180_v40  ;;  %v1037_v37 = vmul.f32 %v1991_v31, %v2180_v40 }
 0x11b   :  { %1877 = vst [vmem:[#allocation8 + $0xa8] sm:$0xff] %v1805_v27   ;;  %v584_v38 = vpop.f32.mrf.mxu0  ;;  %v712_v39 = vpop.f32.mrf.mxu1  ;;  %v1073_v41 = vadd.f32 %v2187_v45, %v1002_v28  ;;  %v1105_v42 = vadd.f32 %v2187_v45, %v1034_v29  ;;  %v1139_v54 = vmax.f32 %v1075_v34, 0.0  ;;  %v1171_v55 = vmax.f32 %v1107_v35, 0.0 }
 0x11c   :  { %1860 = vst [vmem:[#allocation8 + $0x20] sm:$0xff] %v1720_v32   ;;  %1876 = vst [vmem:[#allocation8 + $0xa0] sm:$0xff] %v1800_v33   ;;  %v1003_v43 = vmul.f32 %v2180_v40, %v584_v38  ;;  %v1035_v44 = vmul.f32 %v2180_v40, %v712_v39  ;;  %v1076_v46 = vadd.f32 %v2187_v45, %v1005_v36 }
 0x11d   :  { %v1108_v47 = vadd.f32 %v2187_v45, %v1037_v37  ;;  %v1962_v48 = vpop.f32.mrf.mxu0  ;;  %v1994_v49 = vpop.f32.mrf.mxu1  ;;  %v1137_v60 = vmax.f32 %v1073_v41, 0.0  ;;  %v1169_v61 = vmax.f32 %v1105_v42, 0.0 }
 0x11e   :  { %v1074_v50 = vadd.f32 %v2187_v45, %v1003_v43  ;;  %v1106_v51 = vadd.f32 %v2187_v45, %v1035_v44  ;;  %v1008_v52 = vmul.f32 %v1962_v48, %v2180_v40  ;;  %v1040_v53 = vmul.f32 %v1994_v49, %v2180_v40 }
 0x11f   :  { %v1140_v56 = vmax.f32 %v1076_v46, 0.0  ;;  %v1172_v57 = vmax.f32 %v1108_v47, 0.0  ;;  %v597_v58 = vpop.f32.mrf.mxu0  ;;  %v725_v59 = vpop.f32.mrf.mxu1 }
 0x120   :  { %v1138_v62 = vmax.f32 %v1074_v50, 0.0  ;;  %v1170_v63 = vmax.f32 %v1106_v51, 0.0  ;;  %v1006_v2 = vmul.f32 %v2180_v40, %v597_v58  ;;  %v1038_v3 = vmul.f32 %v2180_v40, %v725_v59 }
 0x121   :  { %v1735_v0 = vpack.c.bf16 %v1140_v56, %v1139_v54  ;;  %v1815_v1 = vpack.c.bf16 %v1172_v57, %v1171_v55  ;;  %v1963_v4 = vpop.f32.mrf.mxu0  ;;  %v1995_v5 = vpop.f32.mrf.mxu1  ;;  %v1079_v8 = vadd.f32 %v2187_v45, %v1008_v52  ;;  %v1111_v9 = vadd.f32 %v2187_v45, %v1040_v53 }
 0x122   :  { %v1730_v6 = vpack.c.bf16 %v1138_v62, %v1137_v60  ;;  %v1810_v7 = vpack.c.bf16 %v1170_v63, %v1169_v61  ;;  %v1009_v10 = vmul.f32 %v1963_v4, %v2180_v40  ;;  %v1041_v11 = vmul.f32 %v1995_v5, %v2180_v40 }
 0x123   :  { %1863 = vst [vmem:[#allocation8 + $0x38] sm:$0xff] %v1735_v0   ;;  %1879 = vst [vmem:[#allocation8 + $0xb8] sm:$0xff] %v1815_v1   ;;  %v600_v12 = vpop.f32.mrf.mxu0  ;;  %v728_v13 = vpop.f32.mrf.mxu1  ;;  %v1077_v14 = vadd.f32 %v2187_v45, %v1006_v2  ;;  %v1109_v15 = vadd.f32 %v2187_v45, %v1038_v3  ;;  %v1143_v22 = vmax.f32 %v1079_v8, 0.0  ;;  %v1175_v23 = vmax.f32 %v1111_v9, 0.0 }
 0x124   :  { %1862 = vst [vmem:[#allocation8 + $0x30] sm:$0xff] %v1730_v6   ;;  %1878 = vst [vmem:[#allocation8 + $0xb0] sm:$0xff] %v1810_v7   ;;  %v1007_v16 = vmul.f32 %v2180_v40, %v600_v12  ;;  %v1039_v17 = vmul.f32 %v2180_v40, %v728_v13  ;;  %v1080_v18 = vadd.f32 %v2187_v45, %v1009_v10 }
 0x125   :  { %v1112_v19 = vadd.f32 %v2187_v45, %v1041_v11  ;;  %v1966_v20 = vpop.f32.mrf.mxu0  ;;  %v1998_v21 = vpop.f32.mrf.mxu1  ;;  %v1141_v32 = vmax.f32 %v1077_v14, 0.0  ;;  %v1173_v33 = vmax.f32 %v1109_v15, 0.0 }
 0x126   :  { %v1078_v24 = vadd.f32 %v2187_v45, %v1007_v16  ;;  %v1110_v25 = vadd.f32 %v2187_v45, %v1039_v17  ;;  %v1144_v26 = vmax.f32 %v1080_v18, 0.0  ;;  %v1012_v28 = vmul.f32 %v1966_v20, %v2180_v40 }
 0x127   :  { %v1176_v27 = vmax.f32 %v1112_v19, 0.0  ;;  %v1044_v29 = vmul.f32 %v1998_v21, %v2180_v40  ;;  %v613_v30 = vpop.f32.mrf.mxu0  ;;  %v741_v31 = vpop.f32.mrf.mxu1 }
 0x128   :  { %v1142_v34 = vmax.f32 %v1078_v24, 0.0  ;;  %v1174_v35 = vmax.f32 %v1110_v25, 0.0  ;;  %v1745_v36 = vpack.c.bf16 %v1144_v26, %v1143_v22  ;;  %v1010_v38 = vmul.f32 %v2180_v40, %v613_v30 }
 0x129   :  { %v1825_v37 = vpack.c.bf16 %v1176_v27, %v1175_v23  ;;  %v1042_v39 = vmul.f32 %v2180_v40, %v741_v31  ;;  %v1967_v41 = vpop.f32.mrf.mxu0  ;;  %v1999_v42 = vpop.f32.mrf.mxu1  ;;  %v1083_v46 = vadd.f32 %v2187_v45, %v1012_v28  ;;  %v1115_v47 = vadd.f32 %v2187_v45, %v1044_v29 }
 0x12a   :  { %v1740_v43 = vpack.c.bf16 %v1142_v34, %v1141_v32  ;;  %v1820_v44 = vpack.c.bf16 %v1174_v35, %v1173_v33  ;;  %1865 = vst [vmem:[#allocation8 + $0x48] sm:$0xff] %v1745_v36   ;;  %v1013_v48 = vmul.f32 %v1967_v41, %v2180_v40  ;;  %v1045_v49 = vmul.f32 %v1999_v42, %v2180_v40 }
 0x12b   :  { %1881 = vst [vmem:[#allocation8 + $0xc8] sm:$0xff] %v1825_v37   ;;  %v616_v50 = vpop.f32.mrf.mxu0  ;;  %v744_v51 = vpop.f32.mrf.mxu1  ;;  %v1081_v52 = vadd.f32 %v2187_v45, %v1010_v38  ;;  %v1113_v53 = vadd.f32 %v2187_v45, %v1042_v39  ;;  %v1147_v0 = vmax.f32 %v1083_v46, 0.0  ;;  %v1179_v1 = vmax.f32 %v1115_v47, 0.0 }
 0x12c   :  { %1864 = vst [vmem:[#allocation8 + $0x40] sm:$0xff] %v1740_v43   ;;  %1880 = vst [vmem:[#allocation8 + $0xc0] sm:$0xff] %v1820_v44   ;;  %v1011_v54 = vmul.f32 %v2180_v40, %v616_v50  ;;  %v1043_v55 = vmul.f32 %v2180_v40, %v744_v51  ;;  %v1084_v56 = vadd.f32 %v2187_v45, %v1013_v48 }
 0x12d   :  { %v1116_v57 = vadd.f32 %v2187_v45, %v1045_v49  ;;  %v1970_v58 = vpop.f32.mrf.mxu0  ;;  %v2002_v59 = vpop.f32.mrf.mxu1  ;;  %v1145_v6 = vmax.f32 %v1081_v52, 0.0  ;;  %v1177_v7 = vmax.f32 %v1113_v53, 0.0 }
 0x12e   :  { %v1082_v60 = vadd.f32 %v2187_v45, %v1011_v54  ;;  %v1114_v61 = vadd.f32 %v2187_v45, %v1043_v55  ;;  %v1016_v62 = vmul.f32 %v1970_v58, %v2180_v40  ;;  %v1048_v63 = vmul.f32 %v2002_v59, %v2180_v40 }
 0x12f   :  { %v1148_v2 = vmax.f32 %v1084_v56, 0.0  ;;  %v1180_v3 = vmax.f32 %v1116_v57, 0.0  ;;  %v629_v4 = vpop.f32.mrf.mxu0  ;;  %v757_v5 = vpop.f32.mrf.mxu1 }
 0x130   :  { %v1146_v8 = vmax.f32 %v1082_v60, 0.0  ;;  %v1178_v9 = vmax.f32 %v1114_v61, 0.0  ;;  %v1014_v12 = vmul.f32 %v2180_v40, %v629_v4  ;;  %v1046_v13 = vmul.f32 %v2180_v40, %v757_v5 }
 0x131   :  { %v1755_v10 = vpack.c.bf16 %v1148_v2, %v1147_v0  ;;  %v1835_v11 = vpack.c.bf16 %v1180_v3, %v1179_v1  ;;  %v1971_v14 = vpop.f32.mrf.mxu0  ;;  %v2003_v15 = vpop.f32.mrf.mxu1  ;;  %v1087_v18 = vadd.f32 %v2187_v45, %v1016_v62  ;;  %v1119_v19 = vadd.f32 %v2187_v45, %v1048_v63 }
 0x132   :  { %v1750_v16 = vpack.c.bf16 %v1146_v8, %v1145_v6  ;;  %v1830_v17 = vpack.c.bf16 %v1178_v9, %v1177_v7  ;;  %v1017_v20 = vmul.f32 %v1971_v14, %v2180_v40  ;;  %v1049_v21 = vmul.f32 %v2003_v15, %v2180_v40 }
 0x133   :  { %1867 = vst [vmem:[#allocation8 + $0x58] sm:$0xff] %v1755_v10   ;;  %1883 = vst [vmem:[#allocation8 + $0xd8] sm:$0xff] %v1835_v11   ;;  %v632_v22 = vpop.f32.mrf.mxu0  ;;  %v760_v23 = vpop.f32.mrf.mxu1  ;;  %v1085_v24 = vadd.f32 %v2187_v45, %v1014_v12  ;;  %v1117_v25 = vadd.f32 %v2187_v45, %v1046_v13  ;;  %v1151_v32 = vmax.f32 %v1087_v18, 0.0  ;;  %v1183_v33 = vmax.f32 %v1119_v19, 0.0 }
 0x134   :  { %1866 = vst [vmem:[#allocation8 + $0x50] sm:$0xff] %v1750_v16   ;;  %1882 = vst [vmem:[#allocation8 + $0xd0] sm:$0xff] %v1830_v17   ;;  %v1015_v26 = vmul.f32 %v2180_v40, %v632_v22  ;;  %v1047_v27 = vmul.f32 %v2180_v40, %v760_v23  ;;  %v1088_v28 = vadd.f32 %v2187_v45, %v1017_v20 }
 0x135   :  { %v1120_v29 = vadd.f32 %v2187_v45, %v1049_v21  ;;  %v1974_v30 = vpop.f32.mrf.mxu0  ;;  %v2006_v31 = vpop.f32.mrf.mxu1  ;;  %v1149_v43 = vmax.f32 %v1085_v24, 0.0  ;;  %v1181_v44 = vmax.f32 %v1117_v25, 0.0 }
 0x136   :  { %v1086_v34 = vadd.f32 %v2187_v45, %v1015_v26  ;;  %v1118_v35 = vadd.f32 %v2187_v45, %v1047_v27  ;;  %v1152_v36 = vmax.f32 %v1088_v28, 0.0  ;;  %v1020_v38 = vmul.f32 %v1974_v30, %v2180_v40 }
 0x137   :  { %v1184_v37 = vmax.f32 %v1120_v29, 0.0  ;;  %v1052_v39 = vmul.f32 %v2006_v31, %v2180_v40  ;;  %v645_v41 = vpop.f32.mrf.mxu0  ;;  %v773_v42 = vpop.f32.mrf.mxu1 }
 0x138   :  { %v1150_v46 = vmax.f32 %v1086_v34, 0.0  ;;  %v1182_v47 = vmax.f32 %v1118_v35, 0.0  ;;  %v1765_v48 = vpack.c.bf16 %v1152_v36, %v1151_v32  ;;  %v1018_v50 = vmul.f32 %v2180_v40, %v645_v41 }
 0x139   :  { %v1845_v49 = vpack.c.bf16 %v1184_v37, %v1183_v33  ;;  %v1050_v51 = vmul.f32 %v2180_v40, %v773_v42  ;;  %v1975_v52 = vpop.f32.mrf.mxu0  ;;  %v2007_v53 = vpop.f32.mrf.mxu1  ;;  %v1091_v56 = vadd.f32 %v2187_v45, %v1020_v38  ;;  %v1123_v57 = vadd.f32 %v2187_v45, %v1052_v39 }
 0x13a   :  { %v1760_v54 = vpack.c.bf16 %v1150_v46, %v1149_v43  ;;  %v1840_v55 = vpack.c.bf16 %v1182_v47, %v1181_v44  ;;  %1869 = vst [vmem:[#allocation8 + $0x68] sm:$0xff] %v1765_v48   ;;  %v1021_v58 = vmul.f32 %v1975_v52, %v2180_v40  ;;  %v1053_v59 = vmul.f32 %v2007_v53, %v2180_v40 }
 0x13b   :  { %1885 = vst [vmem:[#allocation8 + $0xe8] sm:$0xff] %v1845_v49   ;;  %v648_v60 = vpop.f32.mrf.mxu0  ;;  %v776_v61 = vpop.f32.mrf.mxu1  ;;  %v1089_v62 = vadd.f32 %v2187_v45, %v1018_v50  ;;  %v1121_v63 = vadd.f32 %v2187_v45, %v1050_v51  ;;  %v1155_v6 = vmax.f32 %v1091_v56, 0.0  ;;  %v1187_v7 = vmax.f32 %v1123_v57, 0.0 }
 0x13c   :  { %1868 = vst [vmem:[#allocation8 + $0x60] sm:$0xff] %v1760_v54   ;;  %1884 = vst [vmem:[#allocation8 + $0xe0] sm:$0xff] %v1840_v55   ;;  %v1019_v0 = vmul.f32 %v2180_v40, %v648_v60  ;;  %v1051_v1 = vmul.f32 %v2180_v40, %v776_v61  ;;  %v1092_v2 = vadd.f32 %v2187_v45, %v1021_v58 }
 0x13d   :  { %v1124_v3 = vadd.f32 %v2187_v45, %v1053_v59  ;;  %v1153_v10 = vmax.f32 %v1089_v62, 0.0  ;;  %v1185_v11 = vmax.f32 %v1121_v63, 0.0 }
 0x13e   :  { %v1090_v4 = vadd.f32 %v2187_v45, %v1019_v0  ;;  %v1122_v5 = vadd.f32 %v2187_v45, %v1051_v1  ;;  %v1156_v8 = vmax.f32 %v1092_v2, 0.0 }
 0x13f   :  { %v1188_v9 = vmax.f32 %v1124_v3, 0.0 }
 0x140   :  { %v1154_v12 = vmax.f32 %v1090_v4, 0.0  ;;  %v1186_v13 = vmax.f32 %v1122_v5, 0.0  ;;  %v1775_v14 = vpack.c.bf16 %v1156_v8, %v1155_v6 }
 0x141   :  { %v1855_v40 = vpack.c.bf16 %v1188_v9, %v1187_v7 }
 0x142   :  { %v1770_v15 = vpack.c.bf16 %v1154_v12, %v1153_v10  ;;  %v1850_v16 = vpack.c.bf16 %v1186_v13, %v1185_v11  ;;  %1871 = vst [vmem:[#allocation8 + $0x78] sm:$0xff] %v1775_v14  }
 0x143   :  { %1887 = vst [vmem:[#allocation8 + $0xf8] sm:$0xff] %v1855_v40  }
 0x144   :  { %1870 = vst [vmem:[#allocation8 + $0x70] sm:$0xff] %v1770_v15   ;;  %1886 = vst [vmem:[#allocation8 + $0xf0] sm:$0xff] %v1850_v16  }
 0x145   :  { %2120 = shalt.err (!%p2117_p0)
}
 0x146   :  { %1520 = dma.vmem_to_hbm [thread:$0]  %s1515_s3, 4096, %s2325_s4, [#allocation5], %s2136_s18, %s2136_s18, %s2137_s19  }
 0x147   :  { %2133 = dma.done.wait [#allocation5], 4096  }
 0x148   :  { %2134 = vsyncadd [#allocation5], 4294963200 }
 0x149   :  { %1524 = vsyncpa [#allocation4], 1 }
 0x14a   :  { %1525 = vsyncpa [#allocation7], 1 }
 0x14b   :  { %1526 = vsyncpa [#allocation5], 1 }

</bundles_post_ra>
